<compile_context>
chip_gen: v5e
topology: v5e:2x2
jax: 0.10.0
libtpu: 0.0.40
codegen_flags: <defaults>
</compile_context>

<pallas_src>
import math

import jax
import jax.numpy as jnp
import numpy as np
from jax.experimental import pallas as pl
from jax.experimental.pallas import tpu as pltpu


def preprocess_forward(x_nchw, weight_oihw, *, vmem_budget_bytes=8 << 20):
    """PreProcess.forward for dataset='cifar'.  Returns (y_nchw, pred=[])."""
    N, Cin, H, W = x_nchw.shape
    Cout, _, KH, KW = weight_oihw.shape          # 3x3 kernel
    Hp, Wp = H + 2, W + 2                         # spatially padded dims
    HWp = Hp * Wp                                 # padded flat spatial size
    S = ((HWp + 127) // 128) * 128                # per-image stride (lane aligned)
    PAD_F = Wp + 1                                # flat halo for the 3x3 taps
    Kf = Cin * KH * KW                            # 27
    Kp = ((Kf + 7) // 8) * 8                      # 32 (clean sublane tiles)

    # ---- weights: OIHW -> (Cout, K) with K order = (ky, kx, ci), zero-pad K.
    w2d = weight_oihw.transpose(0, 2, 3, 1).reshape(Cout, Kf)
    w2d = jnp.pad(w2d, ((0, 0), (0, Kp - Kf))).astype(jnp.float32)

    # ---- VMEM-budgeted batch tiling (images per grid step).
    # rough per-image bytes: 2x in-block (8 sublanes) + operand scratch +
    # acc + 2x out-block, all f32, all ~S lanes wide.
    bytes_per_image = 4 * S * (2 * 8 + Kp + 3 * Cout)
    Bt = max(1, min(N, vmem_budget_bytes // bytes_per_image, 128))
    grid_n = -(-N // Bt)
    Npad = grid_n * Bt
    Lt = Bt * S                                    # lane width of one chunk
    Gc = Lt + 2 * PAD_F                            # chunk width incl. halo

    # ---- input glue (cheap, ~|x|): spatial pad, channel-major, flat-per-image
    # stride S, then per-chunk halo padding.  No 9x im2col expansion in HBM.
    xp = jnp.pad(x_nchw.astype(jnp.float32),
                 ((0, Npad - N), (0, 0), (1, 1), (1, 1)))     # (Npad,Cin,Hp,Wp)
    xf = xp.transpose(1, 0, 2, 3).reshape(Cin, Npad, HWp)     # (Cin,Npad,HWp)
    xf = jnp.pad(xf, ((0, 0), (0, 0), (0, S - HWp)))          # (Cin,Npad,S)
    xf = xf.reshape(Cin, grid_n, Lt)                          # (Cin,grid_n,Lt)
    xg = jnp.pad(xf, ((0, 0), (0, 0), (PAD_F, PAD_F)))        # (Cin,grid_n,Gc)
    xg = xg.transpose(1, 0, 2)                                # (grid_n,Cin,Gc)

    def kernel(w_ref, xg_ref, o_ref, p_ref):
        # w_ref : (Cout, Kp)   flattened weights (K order = ky, kx, ci)
        # xg_ref: (Cin, Gc)    one chunk: Bt images, padded-flat + halo
        # o_ref : (Bt, Cout, S) per-image padded-flat output (tail cols junk)
        # p_ref : (Kp, Lt)     VMEM scratch: fused im2col operand
        if Kp > Kf:
            @pl.when(pl.program_id(0) == 0)
            def _init():                           # scratch persists: zero once
                p_ref[Kf:Kp, :] = jnp.zeros((Kp - Kf, Lt), jnp.float32)

        # in-VMEM im2col: 9 static shifted lane-slices of the halo'd chunk.
        for ky in range(KH):
            for kx in range(KW):
                t = ky * KW + kx
                d = ky * Wp + kx
                p_ref[t * Cin:(t + 1) * Cin, :] = xg_ref[:, d:d + Lt]

        # one fused-K MXU matmul for the whole chunk (batch on the lane axis).
        acc = jnp.dot(w_ref[...], p_ref[...],
                      preferred_element_type=jnp.float32)      # (Cout, Lt)

        # 128-aligned per-image lane-slice write-back (S % 128 == 0).
        for b in range(Bt):
            o_ref[b] = acc[:, b * S:(b + 1) * S].astype(o_ref.dtype)

    out = pl.pallas_call(
        kernel,
        out_shape=jax.ShapeDtypeStruct((Npad, Cout, S), jnp.float32),
        grid_spec=pltpu.PrefetchScalarGridSpec(
            num_scalar_prefetch=0,
            grid=(grid_n,),
            in_specs=[
                pl.BlockSpec((Cout, Kp), lambda n: (0, 0)),        # weights
                pl.BlockSpec((None, Cin, Gc), lambda n: (n, 0, 0)),  # one chunk
            ],
            out_specs=pl.BlockSpec((Bt, Cout, S), lambda n: (n, 0, 0)),
            scratch_shapes=[pltpu.VMEM((Kp, Lt), jnp.float32)],
        ),
        compiler_params=pltpu.CompilerParams(
            dimension_semantics=("parallel",)),
    )(w2d, xg)

    # trim junk columns/rows, un-flatten, drop the spatial halo.
    y = out[:N, :, :HWp].reshape(N, Cout, Hp, Wp)[:, :, 1:-1, 1:-1]
    pred = []                                     # forward returns empty list
    return y.astype(x_nchw.dtype), pred
    # TODO(synk): 'imagenet' branch (7x7 s2 conv + BN + ReLU + maxpool) is not
    # used by the default constructor and is not implemented here.


if __name__ == "__main__":
    N, Cin, H, W, Cout = 2, 3, 16, 16, 16

    key = jax.random.PRNGKey(0)
    kx_key, kw_key = jax.random.split(key)

    x = jax.random.normal(kx_key, (N, Cin, H, W), dtype=jnp.float32)

    # Deterministic Conv2d weight init (kaiming-uniform-style bound), OIHW.
    fan_in = Cin * 3 * 3
    bound = 1.0 / math.sqrt(fan_in)
    weight = jax.random.uniform(kw_key, (Cout, Cin, 3, 3),
                                minval=-bound, maxval=bound,
                                dtype=jnp.float32)

    out, pred = preprocess_forward(x, weight)
    out = jax.block_until_ready(out)

    # Reference check against XLA's conv.
    ref = jax.lax.conv_general_dilated(
        x, weight, window_strides=(1, 1), padding=((1, 1), (1, 1)),
        dimension_numbers=("NCHW", "OIHW", "NCHW"))
    assert out.shape == ref.shape == (N, Cout, H, W)
    assert pred == []
    np.testing.assert_allclose(np.asarray(out), np.asarray(ref),
                               rtol=1e-5, atol=1e-5)
    print("KERNEL_OK")
</pallas_src>

<mosaic_0001>
module attributes {stable_mosaic.version = 11 : i64} {
  func.func @kernel(%arg0: i32, %arg1: memref<16x32xf32, #tpu.memory_space<vmem>>, %arg2: memref<1x3x806xf32, #tpu.memory_space<vmem>>, %arg3: memref<2x16x384xf32, #tpu.memory_space<vmem>>, %arg4: memref<32x768xf32, #tpu.memory_space<vmem>>) attributes {dimension_semantics = [#tpu.dimension_semantics<parallel>], iteration_bounds = array<i64: 1>, scalar_prefetch = 0 : i64, scratch_operands = 1 : i64, tpu.core_type = #tpu.core_type<tc>, window_params = [{pipeline_mode = #tpu.pipeline_mode<synchronous>, transform_indices = @transform_0, window_bounds = array<i64: 16, 32>}, {transform_indices = @transform_1, window_bounds = array<i64: 1, 3, 806>}, {transform_indices = @transform_2, window_bounds = array<i64: 2, 16, 384>}]} {
    %c0_i32 = arith.constant 0 : i32
    %0 = arith.cmpi eq, %arg0, %c0_i32 : i32
    %1 = arith.extui %0 : i1 to i32
    %c0_i32_0 = arith.constant 0 : i32
    %2 = arith.cmpi ne, %1, %c0_i32_0 : i32
    scf.if %2 {
      %cst_40 = arith.constant 0.000000e+00 : f32
      %41 = vector.broadcast %cst_40 : f32 to vector<5x768xf32>
      %c27 = arith.constant 27 : index
      %c0_41 = arith.constant 0 : index
      %42 = vector.load %arg4[%c27, %c0_41] : memref<32x768xf32, #tpu.memory_space<vmem>>, vector<5x768xf32>
      tpu.vector_store %arg4[%c27, %c0_41], %41 {strides = array<i32>} : memref<32x768xf32, #tpu.memory_space<vmem>>, vector<5x768xf32>,
    } else {
    }
    %c0 = arith.constant 0 : index
    %c0_1 = arith.constant 0 : index
    %c0_2 = arith.constant 0 : index
    %3 = vector.load %arg2[%c0, %c0_1, %c0_2] : memref<1x3x806xf32, #tpu.memory_space<vmem>>, vector<1x3x768xf32>
    %4 = vector.shape_cast %3 : vector<1x3x768xf32> to vector<3x768xf32>
    %c0_3 = arith.constant 0 : index
    %c0_4 = arith.constant 0 : index
    %5 = vector.load %arg4[%c0_3, %c0_4] : memref<32x768xf32, #tpu.memory_space<vmem>>, vector<3x768xf32>
    tpu.vector_store %arg4[%c0_3, %c0_4], %4 {strides = array<i32>} : memref<32x768xf32, #tpu.memory_space<vmem>>, vector<3x768xf32>,
    %c0_5 = arith.constant 0 : index
    %c0_6 = arith.constant 0 : index
    %c1 = arith.constant 1 : index
    %6 = vector.load %arg2[%c0_5, %c0_6, %c1] : memref<1x3x806xf32, #tpu.memory_space<vmem>>, vector<1x3x768xf32>
    %7 = vector.shape_cast %6 : vector<1x3x768xf32> to vector<3x768xf32>
    %c3 = arith.constant 3 : index
    %c0_7 = arith.constant 0 : index
    %8 = vector.load %arg4[%c3, %c0_7] : memref<32x768xf32, #tpu.memory_space<vmem>>, vector<3x768xf32>
    tpu.vector_store %arg4[%c3, %c0_7], %7 {strides = array<i32>} : memref<32x768xf32, #tpu.memory_space<vmem>>, vector<3x768xf32>,
    %c0_8 = arith.constant 0 : index
    %c0_9 = arith.constant 0 : index
    %c2 = arith.constant 2 : index
    %9 = vector.load %arg2[%c0_8, %c0_9, %c2] : memref<1x3x806xf32, #tpu.memory_space<vmem>>, vector<1x3x768xf32>
    %10 = vector.shape_cast %9 : vector<1x3x768xf32> to vector<3x768xf32>
    %c6 = arith.constant 6 : index
    %c0_10 = arith.constant 0 : index
    %11 = vector.load %arg4[%c6, %c0_10] : memref<32x768xf32, #tpu.memory_space<vmem>>, vector<3x768xf32>
    tpu.vector_store %arg4[%c6, %c0_10], %10 {strides = array<i32>} : memref<32x768xf32, #tpu.memory_space<vmem>>, vector<3x768xf32>,
    %c0_11 = arith.constant 0 : index
    %c0_12 = arith.constant 0 : index
    %c18 = arith.constant 18 : index
    %12 = vector.load %arg2[%c0_11, %c0_12, %c18] : memref<1x3x806xf32, #tpu.memory_space<vmem>>, vector<1x3x768xf32>
    %13 = vector.shape_cast %12 : vector<1x3x768xf32> to vector<3x768xf32>
    %c9 = arith.constant 9 : index
    %c0_13 = arith.constant 0 : index
    %14 = vector.load %arg4[%c9, %c0_13] : memref<32x768xf32, #tpu.memory_space<vmem>>, vector<3x768xf32>
    tpu.vector_store %arg4[%c9, %c0_13], %13 {strides = array<i32>} : memref<32x768xf32, #tpu.memory_space<vmem>>, vector<3x768xf32>,
    %c0_14 = arith.constant 0 : index
    %c0_15 = arith.constant 0 : index
    %c19 = arith.constant 19 : index
    %15 = vector.load %arg2[%c0_14, %c0_15, %c19] : memref<1x3x806xf32, #tpu.memory_space<vmem>>, vector<1x3x768xf32>
    %16 = vector.shape_cast %15 : vector<1x3x768xf32> to vector<3x768xf32>
    %c12 = arith.constant 12 : index
    %c0_16 = arith.constant 0 : index
    %17 = vector.load %arg4[%c12, %c0_16] : memref<32x768xf32, #tpu.memory_space<vmem>>, vector<3x768xf32>
    tpu.vector_store %arg4[%c12, %c0_16], %16 {strides = array<i32>} : memref<32x768xf32, #tpu.memory_space<vmem>>, vector<3x768xf32>,
    %c0_17 = arith.constant 0 : index
    %c0_18 = arith.constant 0 : index
    %c20 = arith.constant 20 : index
    %18 = vector.load %arg2[%c0_17, %c0_18, %c20] : memref<1x3x806xf32, #tpu.memory_space<vmem>>, vector<1x3x768xf32>
    %19 = vector.shape_cast %18 : vector<1x3x768xf32> to vector<3x768xf32>
    %c15 = arith.constant 15 : index
    %c0_19 = arith.constant 0 : index
    %20 = vector.load %arg4[%c15, %c0_19] : memref<32x768xf32, #tpu.memory_space<vmem>>, vector<3x768xf32>
    tpu.vector_store %arg4[%c15, %c0_19], %19 {strides = array<i32>} : memref<32x768xf32, #tpu.memory_space<vmem>>, vector<3x768xf32>,
    %c0_20 = arith.constant 0 : index
    %c0_21 = arith.constant 0 : index
    %c36 = arith.constant 36 : index
    %21 = vector.load %arg2[%c0_20, %c0_21, %c36] : memref<1x3x806xf32, #tpu.memory_space<vmem>>, vector<1x3x768xf32>
    %22 = vector.shape_cast %21 : vector<1x3x768xf32> to vector<3x768xf32>
    %c18_22 = arith.constant 18 : index
    %c0_23 = arith.constant 0 : index
    %23 = vector.load %arg4[%c18_22, %c0_23] : memref<32x768xf32, #tpu.memory_space<vmem>>, vector<3x768xf32>
    tpu.vector_store %arg4[%c18_22, %c0_23], %22 {strides = array<i32>} : memref<32x768xf32, #tpu.memory_space<vmem>>, vector<3x768xf32>,
    %c0_24 = arith.constant 0 : index
    %c0_25 = arith.constant 0 : index
    %c37 = arith.constant 37 : index
    %24 = vector.load %arg2[%c0_24, %c0_25, %c37] : memref<1x3x806xf32, #tpu.memory_space<vmem>>, vector<1x3x768xf32>
    %25 = vector.shape_cast %24 : vector<1x3x768xf32> to vector<3x768xf32>
    %c21 = arith.constant 21 : index
    %c0_26 = arith.constant 0 : index
    %26 = vector.load %arg4[%c21, %c0_26] : memref<32x768xf32, #tpu.memory_space<vmem>>, vector<3x768xf32>
    tpu.vector_store %arg4[%c21, %c0_26], %25 {strides = array<i32>} : memref<32x768xf32, #tpu.memory_space<vmem>>, vector<3x768xf32>,
    %c0_27 = arith.constant 0 : index
    %c0_28 = arith.constant 0 : index
    %c38 = arith.constant 38 : index
    %27 = vector.load %arg2[%c0_27, %c0_28, %c38] : memref<1x3x806xf32, #tpu.memory_space<vmem>>, vector<1x3x768xf32>
    %28 = vector.shape_cast %27 : vector<1x3x768xf32> to vector<3x768xf32>
    %c24 = arith.constant 24 : index
    %c0_29 = arith.constant 0 : index
    %29 = vector.load %arg4[%c24, %c0_29] : memref<32x768xf32, #tpu.memory_space<vmem>>, vector<3x768xf32>
    tpu.vector_store %arg4[%c24, %c0_29], %28 {strides = array<i32>} : memref<32x768xf32, #tpu.memory_space<vmem>>, vector<3x768xf32>,
    %c0_30 = arith.constant 0 : index
    %c0_31 = arith.constant 0 : index
    %30 = vector.load %arg1[%c0_30, %c0_31] : memref<16x32xf32, #tpu.memory_space<vmem>>, vector<16x32xf32>
    %c0_32 = arith.constant 0 : index
    %c0_33 = arith.constant 0 : index
    %31 = vector.load %arg4[%c0_32, %c0_33] : memref<32x768xf32, #tpu.memory_space<vmem>>, vector<32x768xf32>
    %cst = arith.constant dense<0.000000e+00> : vector<16x768xf32>
    %32 = tpu.matmul %30, %31, %cst {dimension_numbers = #tpu.dot_dimension_numbers<[1], [0], [0], [1], [0, 0, 1, 1], [], []>} : vector<16x32xf32>, vector<32x768xf32>, vector<16x768xf32> -> vector<16x768xf32>
    %33 = vector.extract_strided_slice %32 {offsets = [0, 0], sizes = [16, 384], strides = [1, 1]} : vector<16x768xf32> to vector<16x384xf32>
    %c0_34 = arith.constant 0 : index
    %c0_35 = arith.constant 0 : index
    %c0_36 = arith.constant 0 : index
    %34 = vector.load %arg3[%c0_34, %c0_35, %c0_36] : memref<2x16x384xf32, #tpu.memory_space<vmem>>, vector<1x16x384xf32>
    %35 = vector.shape_cast %34 : vector<1x16x384xf32> to vector<16x384xf32>
    %36 = vector.shape_cast %33 : vector<16x384xf32> to vector<1x16x384xf32>
    tpu.vector_store %arg3[%c0_34, %c0_35, %c0_36], %36 {strides = array<i32>} : memref<2x16x384xf32, #tpu.memory_space<vmem>>, vector<1x16x384xf32>,
    %37 = vector.extract_strided_slice %32 {offsets = [0, 384], sizes = [16, 384], strides = [1, 1]} : vector<16x768xf32> to vector<16x384xf32>
    %c1_37 = arith.constant 1 : index
    %c0_38 = arith.constant 0 : index
    %c0_39 = arith.constant 0 : index
    %38 = vector.load %arg3[%c1_37, %c0_38, %c0_39] : memref<2x16x384xf32, #tpu.memory_space<vmem>>, vector<1x16x384xf32>
    %39 = vector.shape_cast %38 : vector<1x16x384xf32> to vector<16x384xf32>
    %40 = vector.shape_cast %37 : vector<16x384xf32> to vector<1x16x384xf32>
    tpu.vector_store %arg3[%c1_37, %c0_38, %c0_39], %40 {strides = array<i32>} : memref<2x16x384xf32, #tpu.memory_space<vmem>>, vector<1x16x384xf32>,
    return
  }
  func.func @transform_0(%arg0: i32) -> (i32, i32) {
    %c0_i32 = arith.constant 0 : i32
    %c0_i32_0 = arith.constant 0 : i32
    %c0_i32_1 = arith.constant 0 : i32
    return %c0_i32, %c0_i32_0 : i32, i32
  }
  func.func @transform_1(%arg0: i32) -> (i32, i32, i32) {
    %c0_i32 = arith.constant 0 : i32
    %c0_i32_0 = arith.constant 0 : i32
    %c0_i32_1 = arith.constant 0 : i32
    return %arg0, %c0_i32, %c0_i32_0 : i32, i32, i32
  }
  func.func @transform_2(%arg0: i32) -> (i32, i32, i32) {
    %c0_i32 = arith.constant 0 : i32
    %c0_i32_0 = arith.constant 0 : i32
    %c0_i32_1 = arith.constant 0 : i32
    return %arg0, %c0_i32, %c0_i32_0 : i32, i32, i32
  }
}

</mosaic_0001>

<bundles_post_ra>
// kernel: tpu_custom_call.1
= control target key start
LH: loop header
LB: loop body
LE: loop exit
PB: predicated region body
PF: predicated region fallthrough
CT: control target
= control target key end

     0   :  { %s1196_s0 = inlined_call_operand.vmem [shape: f32[16,32], index: 0, kind: input, shape index: {}]   ;;  %s1197_s1 = inlined_call_operand.vmem [shape: f32[1,3,806], index: 1, kind: input, shape index: {}]   ;;  %s1198_s2 = inlined_call_operand.hbm [shape: f32[2,16,384], index: 2, kind: output, shape index: {}]  }
   0x1   :  { %v23_v0 = vld [vmem:[%s1197_s1 + $0x8] sm:$0x77]  ;;  %v22_v1 = vld [vmem:[%s1197_s1] sm:$0x77]  ;;  %v24_v2 = vld [vmem:[%s1197_s1 + $0x10] sm:$0x77] }
   0x2   :  { %30 = vst [vmem:[#allocation1 + $0x10] ss:$2 sm:$0xff] %v23_v0  ;;  %v52_v3 = vld [vmem:[%s1197_s1 + $0x8] sm:$0x77]  ;;  %v51_v4 = vld [vmem:[%s1197_s1] sm:$0x77] }
   0x3   :  { %28 = vst [vmem:[#allocation1] ss:$2 sm:$0xff] %v22_v1 }
   0x4   :  { %32 = vst [vmem:[#allocation1 + $0x20] ss:$2 sm:$0xff] %v24_v2 }
   0x5   :  { %7 = vsyncpa [#allocation4], 0  ;;  %v114_v9 = vld [vmem:[%s1197_s1 + $0x8] sm:$0x77]  ;;  %v53_v10 = vld [vmem:[%s1197_s1 + $0x10] sm:$0x77] }
   0x6   :  { %v113_v16 = vld [vmem:[%s1197_s1] sm:$0x77]  ;;  %s806_s25 = smov 127   ;;  %v115_v21 = vld [vmem:[%s1197_s1 + $0x10] sm:$0x77]  ;;  %s807_s4 = smov 126  }
   0x7   :  { %v182_v22 = vld [vmem:[%s1197_s1 + $0x8] sm:$0x77]  ;;  %v181_v28 = vld [vmem:[%s1197_s1] sm:$0x77]  ;;  %v183_v33 = vld [vmem:[%s1197_s1 + $0x10] sm:$0x77] }
   0x8   :  { %v244_v34 = vld [vmem:[%s1197_s1 + $0x8] sm:$0x77]  ;;  %v243_v37 = vld [vmem:[%s1197_s1] sm:$0x77]  ;;  %v54_v41 = vld [vmem:[%s1197_s1 + $0x18] sm:$0x7] }
   0x9   :  { %v35_v5 = vld.sshfl [vmem:[#allocation1 + $0x10] sm:$0xff pattern:$0x75316420]  ;;  %v36_v6 = vld.sshfl [vmem:[#allocation1 + $0x18] sm:$0xff pattern:$0x75316420] }
   0xa   :  { %61 = vst [vmem:[#allocation1 + $0x10] ss:$2 sm:$0xff] %v52_v3  ;;  %v33_v7 = vld.sshfl [vmem:[#allocation1] sm:$0xff pattern:$0x75316420]  ;;  %s808_s13 = smov 110  }
   0xb   :  { %47 = vst [vmem:[#allocation2 + $0x58] sm:$0x7] %v35_v5  ;;  %v34_v8 = vld.sshfl [vmem:[#allocation1 + $0x8] sm:$0xff pattern:$0x75316420]  ;;  %s809_s20 = smov 109  }
   0xc   :  { %48 = vst [vmem:[#allocation2 + $0x60] sm:$0x7] %v36_v6  ;;  %v37_v11 = vld.sshfl [vmem:[#allocation1 + $0x20] sm:$0xff pattern:$0x75316420]  ;;  %s810_s9 = smov 108  }
   0xd   :  { %59 = vst [vmem:[#allocation1] ss:$2 sm:$0xff] %v51_v4  ;;  %v38_v12 = vld.sshfl [vmem:[#allocation1 + $0x28] sm:$0xff pattern:$0x75316420]  ;;  %s811_s17 = smov 92  }
   0xe   :  { %45 = vst [vmem:[#allocation2 + $0x10] sm:$0x7] %v33_v7  ;;  %v245_v46 = vld [vmem:[%s1197_s1 + $0x10] sm:$0x77]  ;;  %v300_v47 = vld [vmem:[%s1197_s1 + $0x8] sm:$0x77] }
   0xf   :  { %46 = vst [vmem:[#allocation2 + $0x48] sm:$0x7] %v34_v8  ;;  %v299_v52 = vld [vmem:[%s1197_s1] sm:$0x77]  ;;  %v301_v56 = vld [vmem:[%s1197_s1 + $0x10] sm:$0x77] }
  0x10   :  { %63 = vst [vmem:[#allocation1 + $0x20] ss:$2 sm:$0xff] %v53_v10  ;;  %v116_v57 = vld [vmem:[%s1197_s1 + $0x18] sm:$0x7]  ;;  %v368_v58 = vld [vmem:[%s1197_s1 + $0x8] sm:$0x77] }
  0x11   :  { %v68_v13 = vld.sshfl [vmem:[#allocation1 + $0x10] sm:$0xff pattern:$0x75316420]  ;;  %v854_v14 = vld.sshfl [vmem:[#allocation1 + $0x18] sm:$0xff pattern:$0x75316420] }
  0x12   :  { %v75_v15 = vrot.slane %v68_v13, 5  ;;  %123 = vst [vmem:[#allocation1 + $0x10] ss:$2 sm:$0xff] %v114_v9  ;;  %v367_v63 = vld [vmem:[%s1197_s1] sm:$0x77]  ;;  %s812_s26 = smov 91  }
  0x13   :  { %49 = vst [vmem:[#allocation2 + $0xa8] sm:$0x7] %v37_v11  ;;  %v369_v4 = vld [vmem:[%s1197_s1 + $0x10] sm:$0x77]  ;;  %v430_v5 = vld [vmem:[%s1197_s1 + $0x8] sm:$0x77] }
  0x14   :  { %84 = vrot.lane.b32.xlu2 %v75_v15, %s806_s25  ;;  %v67_v17 = vld.sshfl [vmem:[#allocation1 + $0x8] sm:$0xff pattern:$0x75316420]  ;;  %v66_v18 = vld.sshfl [vmem:[#allocation1] sm:$0xff pattern:$0x75316420] }
  0x15   :  { %v74_v19 = vrot.slane %v67_v17, 5  ;;  %v73_v20 = vrot.slane %v66_v18, 5  ;;  %121 = vst [vmem:[#allocation1] ss:$2 sm:$0xff] %v113_v16  ;;  %v184_v6 = vld [vmem:[%s1197_s1 + $0x18] sm:$0x7] }
  0x16   :  { %50 = vst [vmem:[#allocation2 + $0x68] sm:$0x7] %v38_v12  ;;  %v429_v13 = vld [vmem:[%s1197_s1] sm:$0x77]  ;;  %s813_s29 = smov 90   ;;  %vm94_vm0 = vcmask 1039360  }
  0x17   :  { %82 = vrot.lane.b32.xlu1 %v74_v19, %s806_s25  ;;  %80 = vrot.lane.b32.xlu0 %v73_v20, %s806_s25  ;;  %v868_v23 = vld.sshfl [vmem:[#allocation1 + $0x20] sm:$0xff pattern:$0x75316420]  ;;  %v870_v24 = vld.sshfl [vmem:[#allocation1 + $0x28] sm:$0xff pattern:$0x75316420] }
  0x18   :  { %125 = vst [vmem:[#allocation1 + $0x20] ss:$2 sm:$0xff] %v115_v21  ;;  %v431_v19 = vld [vmem:[%s1197_s1 + $0x10] sm:$0x77]  ;;  %v492_v21 = vld [vmem:[%s1197_s1 + $0x8] sm:$0x77] }
  0x19   :  { %v130_v25 = vld.sshfl [vmem:[#allocation1 + $0x10] sm:$0xff pattern:$0x75316420]  ;;  %v872_v26 = vld.sshfl [vmem:[#allocation1 + $0x18] sm:$0xff pattern:$0x75316420] }
  0x1a   :  { %v137_v27 = vrot.slane %v130_v25, 2  ;;  %191 = vst [vmem:[#allocation1 + $0x10] ss:$2 sm:$0xff] %v182_v22  ;;  %vm156_vm1 = vcmask 1031168   ;;  %vm224_vm2 = vcmask 900096   ;;  %vm342_vm3 = vcmask 883712  }
  0x1b   :  { %65 = vst [vmem:[#allocation1 + $0x30] ss:$2 sm:$0xff] %v54_v41  ;;  %vm280_vm4 = vcmask 891904   ;;  %vm410_vm5 = vcmask 752640   ;;  %vm472_vm6 = vcmask 744448   ;;  %vm527_vm7 = vcmask 736256  }
  0x1c   :  { %146 = vrot.lane.b32.xlu2 %v137_v27, %s807_s4  ;;  %v129_v29 = vld.sshfl [vmem:[#allocation1 + $0x8] sm:$0xff pattern:$0x75316420]  ;;  %v128_v30 = vld.sshfl [vmem:[#allocation1] sm:$0xff pattern:$0x75316420] }
  0x1d   :  { %v136_v31 = vrot.slane %v129_v29, 2  ;;  %v135_v32 = vrot.slane %v128_v30, 2  ;;  %189 = vst [vmem:[#allocation1] ss:$2 sm:$0xff] %v181_v28  ;;  %v491_v30 = vld [vmem:[%s1197_s1] sm:$0x77] }
  0x1e   :  { %vm572_vm8 = vcmask 261120   ;;  %s736_s11 = sshll.u32 %s1198_s2, 4  ;;  %s816_s12 = smov 384   ;;  %s737_s11 = int_to_ptr.hbm [resolvable:$true] %s736_s11 }
  0x1f   :  { %144 = vrot.lane.b32.xlu1 %v136_v31, %s807_s4  ;;  %142 = vrot.lane.b32.xlu0 %v135_v32, %s807_s4  ;;  %v886_v35 = vld.sshfl [vmem:[#allocation1 + $0x20] sm:$0xff pattern:$0x75316420]  ;;  %v888_v36 = vld.sshfl [vmem:[#allocation1 + $0x28] sm:$0xff pattern:$0x75316420] }
  0x20   :  { %193 = vst [vmem:[#allocation1 + $0x20] ss:$2 sm:$0xff] %v183_v33  ;;  %v246_v33 = vld [vmem:[%s1197_s1 + $0x18] sm:$0x7]  ;;  %s817_s14 = smov 24  }
  0x21   :  { %v198_v38 = vld.sshfl [vmem:[#allocation1 + $0x10] sm:$0xff pattern:$0x75316420]  ;;  %v893_v39 = vld.sshfl [vmem:[#allocation1 + $0x18] sm:$0xff pattern:$0x75316420] }
  0x22   :  { %v205_v40 = vrot.slane %v198_v38, 7  ;;  %254 = vst [vmem:[#allocation1 + $0x11] ss:$2 sm:$0xff] %v244_v34  ;;  %v916_v53 = vld.sshfl [vmem:[#allocation1 + $0x30] sm:$0xff pattern:$0x75316420] }
  0x23   :  { %127 = vst [vmem:[#allocation1 + $0x30] ss:$2 sm:$0xff] %v116_v57  ;;  %v493_v38 = vld [vmem:[%s1197_s1 + $0x10] sm:$0x77] }
  0x24   :  { %214 = vrot.lane.b32.xlu2 %v205_v40, %s808_s13  ;;  %v197_v42 = vld.sshfl [vmem:[#allocation1 + $0x8] sm:$0xff pattern:$0x75316420]  ;;  %v196_v43 = vld.sshfl [vmem:[#allocation1] sm:$0xff pattern:$0x75316420] }
  0x25   :  { %v204_v44 = vrot.slane %v197_v42, 7  ;;  %v203_v45 = vrot.slane %v196_v43, 7  ;;  %252 = vst [vmem:[#allocation1 + $0x1] ss:$2 sm:$0xff] %v243_v37 }
  0x27   :  { %212 = vrot.lane.b32.xlu1 %v204_v44, %s808_s13  ;;  %210 = vrot.lane.b32.xlu0 %v203_v45, %s808_s13  ;;  %v907_v48 = vld.sshfl [vmem:[#allocation1 + $0x20] sm:$0xff pattern:$0x75316420]  ;;  %v909_v49 = vld.sshfl [vmem:[#allocation1 + $0x28] sm:$0xff pattern:$0x75316420] }
  0x28   :  { %256 = vst [vmem:[#allocation1 + $0x21] ss:$2 sm:$0xff] %v245_v46  ;;  %v302_v45 = vld [vmem:[%s1197_s1 + $0x18] sm:$0x7] }
  0x29   :  { %v911_v50 = vld.sshfl [vmem:[#allocation1 + $0x18] sm:$0xff pattern:$0x75316420]  ;;  %v261_v51 = vld.sshfl [vmem:[#allocation1 + $0x10] sm:$0xff pattern:$0x75316420] }
  0x2a   :  { %309 = vst [vmem:[#allocation1 + $0x10] ss:$2 sm:$0xff] %v300_v47  ;;  %v950_v10 = vld.sshfl [vmem:[#allocation1 + $0x30] sm:$0xff pattern:$0x75316420] }
  0x2b   :  { %195 = vst [vmem:[#allocation1 + $0x30] ss:$2 sm:$0xff] %v184_v6  ;;  %v206_v6 = vrot.slane %v893_v39, 7 }
  0x2c   :  { %270 = vrot.lane.b32.xlu2 %v261_v51, %s809_s20  ;;  %v260_v54 = vld.sshfl [vmem:[#allocation1 + $0x8] sm:$0xff pattern:$0x75316420]  ;;  %v259_v55 = vld.sshfl [vmem:[#allocation1] sm:$0xff pattern:$0x75316420] }
  0x2d   :  { %307 = vst [vmem:[#allocation1] ss:$2 sm:$0xff] %v299_v52  ;;  %v370_v52 = vld [vmem:[%s1197_s1 + $0x18] sm:$0x7] }
  0x2f   :  { %268 = vrot.lane.b32.xlu1 %v260_v54, %s809_s20  ;;  %266 = vrot.lane.b32.xlu0 %v259_v55, %s809_s20  ;;  %v930_v59 = vld.sshfl [vmem:[#allocation1 + $0x20] sm:$0xff pattern:$0x75316420]  ;;  %v932_v60 = vld.sshfl [vmem:[#allocation1 + $0x28] sm:$0xff pattern:$0x75316420] }
  0x30   :  { %311 = vst [vmem:[#allocation1 + $0x20] ss:$2 sm:$0xff] %v301_v56 }
  0x31   :  { %v316_v61 = vld.sshfl [vmem:[#allocation1 + $0x10] sm:$0xff pattern:$0x75316420]  ;;  %v317_v62 = vld.sshfl [vmem:[#allocation1 + $0x18] sm:$0xff pattern:$0x75316420] }
  0x32   :  { %377 = vst [vmem:[#allocation1 + $0x10] ss:$2 sm:$0xff] %v368_v58  ;;  %v323_v15 = vrot.slane %v316_v61, 1  ;;  %v324_v29 = vrot.slane %v317_v62, 1  ;;  %v432_v58 = vld [vmem:[%s1197_s1 + $0x18] sm:$0x7] }
  0x33   :  { %v970_v32 = vld.sshfl [vmem:[#allocation1 + $0x30] sm:$0xff pattern:$0x75316420] }
  0x34   :  { %v315_v0 = vld.sshfl [vmem:[#allocation1 + $0x8] sm:$0xff pattern:$0x75316420]  ;;  %v314_v1 = vld.sshfl [vmem:[#allocation1] sm:$0xff pattern:$0x75316420] }
  0x35   :  { %v322_v2 = vrot.slane %v315_v0, 1  ;;  %v321_v3 = vrot.slane %v314_v1, 1  ;;  %375 = vst [vmem:[#allocation1] ss:$2 sm:$0xff] %v367_v63  ;;  %v138_v0 = vrot.slane %v872_v26, 2  ;;  %v139_v26 = vrot.slane %v886_v35, 2 }
  0x36   :  { %258 = vst [vmem:[#allocation1 + $0x31] ss:$2 sm:$0xff] %v246_v33 }
  0x37   :  { %330 = vrot.lane.b32.xlu2 %v322_v2, %s810_s9  ;;  %328 = vrot.lane.b32.xlu1 %v321_v3, %s810_s9  ;;  %v318_v7 = vld.sshfl [vmem:[#allocation1 + $0x20] sm:$0xff pattern:$0x75316420]  ;;  %v948_v8 = vld.sshfl [vmem:[#allocation1 + $0x28] sm:$0xff pattern:$0x75316420] }
  0x38   :  { %v325_v9 = vrot.slane %v318_v7, 1  ;;  %379 = vst [vmem:[#allocation1 + $0x20] ss:$2 sm:$0xff] %v369_v4  ;;  %v494_v2 = vld [vmem:[%s1197_s1 + $0x18] sm:$0x7] }
  0x39   :  { %v385_v11 = vld.sshfl [vmem:[#allocation1 + $0x18] sm:$0xff pattern:$0x75316420]  ;;  %v384_v12 = vld.sshfl [vmem:[#allocation1 + $0x10] sm:$0xff pattern:$0x75316420] }
  0x3a   :  { %336 = vrot.lane.b32.xlu0 %v325_v9, %s810_s9  ;;  %439 = vst [vmem:[#allocation1 + $0x10] ss:$2 sm:$0xff] %v430_v5  ;;  %v392_v31 = vrot.slane %v385_v11, 6  ;;  %v391_v43 = vrot.slane %v384_v12, 6  ;;  %v207_v5 = vrot.slane %v907_v48, 7  ;;  %v76_v9 = vrot.slane %v854_v14, 5 }
  0x3b   :  { %v77_v48 = vrot.slane %v868_v23, 5 }
  0x3c   :  { %v383_v16 = vld.sshfl [vmem:[#allocation1 + $0x8] sm:$0xff pattern:$0x75316420]  ;;  %v382_v17 = vld.sshfl [vmem:[#allocation1] sm:$0xff pattern:$0x75316420] }
  0x3d   :  { %v390_v18 = vrot.slane %v383_v16, 6  ;;  %437 = vst [vmem:[#allocation1] ss:$2 sm:$0xff] %v429_v13  ;;  %v389_v20 = vrot.slane %v382_v17, 6 }
  0x3e   :  { %v986_v46 = vld.sshfl [vmem:[#allocation1 + $0x30] sm:$0xff pattern:$0x75316420] }
  0x3f   :  { %332 = vrot.lane.b32.xlu2 %v323_v15, %s810_s9  ;;  %398 = vrot.lane.b32.xlu1 %v390_v18, %s811_s17  ;;  %v386_v22 = vld.sshfl [vmem:[#allocation1 + $0x20] sm:$0xff pattern:$0x75316420]  ;;  %v964_v25 = vld.sshfl [vmem:[#allocation1 + $0x28] sm:$0xff pattern:$0x75316420] }
  0x40   :  { %441 = vst [vmem:[#allocation1 + $0x20] ss:$2 sm:$0xff] %v431_v19  ;;  %v393_v57 = vrot.slane %v386_v22, 6  ;;  %v394_v14 = vrot.slane %v964_v25, 6 }
  0x41   :  { %v446_v27 = vld.sshfl [vmem:[#allocation1 + $0x10] sm:$0xff pattern:$0x75316420]  ;;  %v447_v28 = vld.sshfl [vmem:[#allocation1 + $0x18] sm:$0xff pattern:$0x75316420] }
  0x42   :  { %396 = vrot.lane.b32.xlu0 %v389_v20, %s811_s17  ;;  %501 = vst [vmem:[#allocation1 + $0x10] ss:$2 sm:$0xff] %v492_v21  ;;  %v453_v51 = vrot.slane %v446_v27, 3  ;;  %v454_v4 = vrot.slane %v447_v28, 3  ;;  %v208_v28 = vrot.slane %v909_v49, 7 }
  0x43   :  { %313 = vst [vmem:[#allocation1 + $0x30] ss:$2 sm:$0xff] %v302_v45 }
  0x44   :  { %v444_v34 = vld.sshfl [vmem:[#allocation1] sm:$0xff pattern:$0x75316420]  ;;  %v445_v37 = vld.sshfl [vmem:[#allocation1 + $0x8] sm:$0xff pattern:$0x75316420] }
  0x45   :  { %499 = vst [vmem:[#allocation1] ss:$2 sm:$0xff] %v491_v30  ;;  %v451_v40 = vrot.slane %v444_v34, 3  ;;  %v452_v44 = vrot.slane %v445_v37, 3  ;;  %v140_v30 = vrot.slane %v888_v36, 2  ;;  %v209_v36 = vrot.slane %v970_v32, 7 }
  0x47   :  { %334 = vrot.lane.b32.xlu2 %v324_v29, %s810_s9  ;;  %402 = vrot.lane.b32.xlu1 %v392_v31, %s811_s17  ;;  %v448_v41 = vld.sshfl [vmem:[#allocation1 + $0x20] sm:$0xff pattern:$0x75316420]  ;;  %v980_v42 = vld.sshfl [vmem:[#allocation1 + $0x28] sm:$0xff pattern:$0x75316420] }
  0x48   :  { %503 = vst [vmem:[#allocation1 + $0x20] ss:$2 sm:$0xff] %v493_v38  ;;  %v455_v1 = vrot.slane %v448_v41, 3  ;;  %v141_v29 = vrot.slane %v950_v10, 2 }
  0x49   :  { %v508_v54 = vld.sshfl [vmem:[#allocation1 + $0x10] sm:$0xff pattern:$0x75316420]  ;;  %v509_v63 = vld.sshfl [vmem:[#allocation1 + $0x18] sm:$0xff pattern:$0x75316420] }
  0x4a   :  { %458 = vrot.lane.b32.xlu0 %v451_v40, %s812_s26  ;;  %v320_v55 = vld.sshfl [vmem:[#allocation1 + $0x30] sm:$0xff pattern:$0x75316420] }
  0x4b   :  { %381 = vst [vmem:[#allocation1 + $0x30] ss:$2 sm:$0xff] %v370_v52  ;;  %v327_v13 = vrot.slane %v320_v55, 1  ;;  %v814_v52 = vmov 0.0  }
  0x4c   :  { %v506_v47 = vld.sshfl [vmem:[#allocation1] sm:$0xff pattern:$0x75316420]  ;;  %v507_v56 = vld.sshfl [vmem:[#allocation1 + $0x8] sm:$0xff pattern:$0x75316420] }
  0x4d   :  { %16 = vst [vmem:[#allocation2 + $0x80] sm:$0xf8] %v814_v52 }
  0x4e   :  { %17 = vst [vmem:[#allocation2 + $0x90] sm:$0xf8] %v814_v52 }
  0x4f   :  { %400 = vrot.lane.b32.xlu2 %v391_v43, %s811_s17  ;;  %460 = vrot.lane.b32.xlu1 %v452_v44, %s812_s26  ;;  %v510_v61 = vld.sshfl [vmem:[#allocation1 + $0x20] sm:$0xff pattern:$0x75316420]  ;;  %v511_v39 = vld.sshfl [vmem:[#allocation1 + $0x28] sm:$0xff pattern:$0x75316420] }
  0x50   :  { %v79_v44 = vrot.slane %v916_v53, 5  ;;  %18 = vst [vmem:[#allocation2 + $0xa0] sm:$0xf8] %v814_v52 }
  0x51   :  { %19 = vst [vmem:[#allocation2 + $0x18] sm:$0xf8] %v814_v52 }
  0x52   :  { %513 = vrot.lane.b32.xlu0 %v506_v47, %s813_s29  ;;  %v388_v62 = vld.sshfl [vmem:[#allocation1 + $0x30] sm:$0xff pattern:$0x75316420]  ;;  %20 = vst [vmem:[#allocation2 + $0x30] sm:$0xf8] %v814_v52 }
  0x53   :  { %443 = vst [vmem:[#allocation1 + $0x30] ss:$2 sm:$0xff] %v432_v58  ;;  %v395_v19 = vrot.slane %v388_v62, 6 }
  0x54   :  { %21 = vst [vmem:[#allocation2 + $0xb8] sm:$0xf8] %v814_v52 }
  0x57   :  { %462 = vrot.lane.b32.xlu2 %v453_v51, %s812_s26  ;;  %517 = vrot.lane.b32.xlu1 %v508_v54, %s813_s29 }
  0x5a   :  { %515 = vrot.lane.b32.xlu0 %v507_v56, %s813_s29  ;;  %v450_v3 = vld.sshfl [vmem:[#allocation1 + $0x30] sm:$0xff pattern:$0x75316420] }
  0x5b   :  { %505 = vst [vmem:[#allocation1 + $0x30] ss:$2 sm:$0xff] %v494_v2  ;;  %v457_v18 = vrot.slane %v450_v3, 3 }
  0x5f   :  { %404 = vrot.lane.b32.xlu2 %v393_v57, %s811_s17  ;;  %521 = vrot.lane.b32.xlu1 %v510_v61, %s813_s29 }
  0x62   :  { %519 = vrot.lane.b32.xlu0 %v509_v63, %s813_s29  ;;  %v512_v35 = vld.sshfl [vmem:[#allocation1 + $0x30] sm:$0xff pattern:$0x75316420] }
  0x67   :  { %148 = vrot.lane.b32.xlu2 %v138_v0, %s807_s4  ;;  %466 = vrot.lane.b32.xlu1 %v455_v1, %s812_s26 }
  0x6a   :  { %464 = vrot.lane.b32.xlu0 %v454_v4, %s812_s26 }
  0x6e   :  { %v1013_v7 = vpop.permute.xlu2 %84 }
  0x6f   :  { %218 = vrot.lane.b32.xlu2 %v207_v5, %s808_s13  ;;  %216 = vrot.lane.b32.xlu1 %v206_v6, %s808_s13 }
  0x72   :  { %150 = vrot.lane.b32.xlu0 %v139_v26, %s807_s4 }
  0x76   :  { %v1019_v11 = vpop.permute.xlu2 %146 }
  0x77   :  { %86 = vrot.lane.b32.xlu2 %v76_v9, %s806_s25  ;;  %274 = vrot.lane.b32.xlu1 %v930_v59, %s809_s20  ;;  %v326_v59 = vrot.slane %v948_v8, 1  ;;  %v456_v8 = vrot.slane %v980_v42, 3 }
  0x7a   :  { %272 = vrot.lane.b32.xlu0 %v911_v50, %s809_s20 }
  0x7e   :  { %v1027_v12 = vpop.permute.xlu2 %214 }
  0x7f   :  { %525 = vrot.lane.b32.xlu2 %v512_v35, %s813_s29  ;;  %523 = vrot.lane.b32.xlu1 %v511_v39, %s813_s29 }
  0x82   :  { %88 = vrot.lane.b32.xlu0 %v77_v48, %s806_s25 }
  0x86   :  { %v1036_v50 = vpop.permute.xlu2 %270 }
  0x87   :  { %406 = vrot.lane.b32.xlu2 %v394_v14, %s811_s17  ;;  %340 = vrot.lane.b32.xlu1 %v327_v13, %s810_s9 }
  0x89   :  { %v83_v23 = vpop.permute.xlu1 %82  ;;  %v81_v15 = vpop.permute.xlu0 %80 }
  0x8a   :  { %338 = vrot.lane.b32.xlu0 %v326_v59, %s810_s9  ;;  %v96_v16 = vsel %vm94_vm0, %v83_v23, %v1013_v7  ;;  %v95_v17 = vsel %vm94_vm0, %v81_v15, %v83_v23 }
  0x8b   :  { %108 = vst [vmem:[#allocation2 + $0x48] sm:$0x38] %v96_v16 }
  0x8c   :  { %107 = vst [vmem:[#allocation2 + $0x10] sm:$0x38] %v95_v17 }
  0x8f   :  { %470 = vrot.lane.b32.xlu2 %v457_v18, %s812_s26  ;;  %468 = vrot.lane.b32.xlu1 %v456_v8, %s812_s26 }
  0x91   :  { %v145_v20 = vpop.permute.xlu1 %144  ;;  %v331_v21 = vpop.permute.xlu2 %330 }
  0x92   :  { %408 = vrot.lane.b32.xlu0 %v395_v19, %s811_s17  ;;  %v158_v22 = vsel %vm156_vm1, %v145_v20, %v1019_v11  ;;  %v143_v25 = vpop.permute.xlu0 %142 }
  0x93   :  { %170 = vst [vmem:[#allocation2 + $0x48] sm:$0xc0] %v158_v22  ;;  %v157_v27 = vsel %vm156_vm1, %v143_v25, %v145_v20 }
  0x94   :  { %176 = vst [vmem:[#allocation2 + $0x20] sm:$0x1] %v158_v22 }
  0x95   :  { %169 = vst [vmem:[#allocation2 + $0x10] sm:$0xc0] %v157_v27 }
  0x96   :  { %175 = vst [vmem:[#allocation2 + $0x8] sm:$0x1] %v157_v27 }
  0x97   :  { %220 = vrot.lane.b32.xlu2 %v208_v28, %s808_s13  ;;  %154 = vrot.lane.b32.xlu1 %v141_v29, %s807_s4 }
  0x99   :  { %v213_v31 = vpop.permute.xlu1 %212  ;;  %v333_v33 = vpop.permute.xlu2 %332 }
  0x9a   :  { %152 = vrot.lane.b32.xlu0 %v140_v30, %s807_s4  ;;  %v226_v49 = vsel %vm224_vm2, %v213_v31, %v1027_v12  ;;  %v344_v10 = vsel %vm342_vm3, %v331_v21, %v333_v33  ;;  %v211_v34 = vpop.permute.xlu0 %210  ;;  %v549_v27 = vld [vmem:[#allocation2 + $0x48] sm:$0xff] }
  0x9b   :  { %238 = vst [vmem:[#allocation2 + $0x20] sm:$0xe] %v226_v49  ;;  %v225_v37 = vsel %vm224_vm2, %v211_v34, %v213_v31 }
  0x9c   :  { %356 = vst [vmem:[#allocation2 + $0x20] sm:$0x80] %v344_v10  ;;  %v548_v22 = vld [vmem:[#allocation2 + $0x10] sm:$0xff] }
  0x9d   :  { %362 = vst [vmem:[#allocation2 + $0x28] sm:$0x3] %v344_v10 }
  0x9e   :  { %237 = vst [vmem:[#allocation2 + $0x8] sm:$0xe] %v225_v37 }
  0x9f   :  { %276 = vrot.lane.b32.xlu1 %v932_v60, %s809_s20  ;;  %278 = vrot.lane.b32.xlu2 %v986_v46, %s809_s20  ;;  %v78_v60 = vrot.slane %v870_v24, 5 }
  0xa1   :  { %v269_v38 = vpop.permute.xlu1 %268  ;;  %v335_v40 = vpop.permute.xlu2 %334 }
  0xa2   :  { %222 = vrot.lane.b32.xlu0 %v209_v36, %s808_s13  ;;  %v282_v41 = vsel %vm280_vm4, %v269_v38, %v1036_v50  ;;  %v345_v42 = vsel %vm342_vm3, %v333_v33, %v335_v40  ;;  %v267_v43 = vpop.permute.xlu0 %266 }
  0xa3   :  { %294 = vst [vmem:[#allocation2 + $0x20] sm:$0x70] %v282_v41  ;;  %v281_v32 = vsel %vm280_vm4, %v267_v43, %v269_v38 }
  0xa4   :  { %357 = vst [vmem:[#allocation2 + $0x40] sm:$0x80] %v345_v42 }
  0xa5   :  { %363 = vst [vmem:[#allocation2 + $0x50] sm:$0x3] %v345_v42 }
  0xa6   :  { %293 = vst [vmem:[#allocation2 + $0x8] sm:$0x70] %v281_v32 }
  0xa7   :  { %92 = vrot.lane.b32.xlu1 %v79_v44, %s806_s25 }
  0xa9   :  { %v401_v45 = vpop.permute.xlu2 %400  ;;  %v329_v46 = vpop.permute.xlu1 %328 }
  0xaa   :  { %90 = vrot.lane.b32.xlu0 %v78_v60, %s806_s25  ;;  %v343_v47 = vsel %vm342_vm3, %v329_v46, %v331_v21  ;;  %v555_v21 = vld [vmem:[#allocation2 + $0x20] sm:$0xff] }
  0xab   :  { %355 = vst [vmem:[#allocation2 + $0x8] sm:$0x80] %v343_v47 }
  0xac   :  { %361 = vst [vmem:[#allocation2] sm:$0x3] %v343_v47  ;;  %v1074_v51 = vpop.permute.xlu0 %336 }
  0xad   :  { %v346_v53 = vsel %vm342_vm3, %v335_v40, %v1074_v51 }
  0xae   :  { %358 = vst [vmem:[#allocation2 + $0x70] sm:$0x80] %v346_v53 }
  0xaf   :  { %364 = vst [vmem:[#allocation2 + $0x88] sm:$0x3] %v346_v53 }
  0xb1   :  { %v1078_v24 = vpop.permute.xlu2 %462  ;;  %v399_v54 = vpop.permute.xlu1 %398 }
  0xb2   :  { %v412_v55 = vsel %vm410_vm5, %v399_v54, %v401_v45 }
  0xb3   :  { %424 = vst [vmem:[#allocation2 + $0x28] sm:$0x1c] %v412_v55  ;;  %v1151_v55 = vld [vmem:[%s1196_s0 + $0x8] sm:$0xff] }
  0xb4   :  { %v397_v56 = vpop.permute.xlu0 %396 }
  0xb5   :  { %v411_v57 = vsel %vm410_vm5, %v397_v56, %v399_v54 }
  0xb6   :  { %423 = vst [vmem:[#allocation2] sm:$0x1c] %v411_v57 }
  0xb9   :  { %v1082_v58 = vpop.permute.xlu2 %404  ;;  %v403_v61 = vpop.permute.xlu1 %402 }
  0xba   :  { %v413_v62 = vsel %vm410_vm5, %v401_v45, %v403_v61  ;;  %v414_v63 = vsel %vm410_vm5, %v403_v61, %v1082_v58 }
  0xbb   :  { %425 = vst [vmem:[#allocation2 + $0x50] sm:$0x1c] %v413_v62 }
  0xbc   :  { %426 = vst [vmem:[#allocation2 + $0x88] sm:$0x1c] %v414_v63  ;;  %v459_v0 = vpop.permute.xlu0 %458 }
  0xc1   :  { %v1087_v1 = vpop.permute.xlu2 %148  ;;  %v461_v2 = vpop.permute.xlu1 %460 }
  0xc2   :  { %v159_v3 = vsel %vm156_vm1, %v1019_v11, %v1087_v1  ;;  %v473_v4 = vsel %vm472_vm6, %v459_v0, %v461_v2  ;;  %v474_v5 = vsel %vm472_vm6, %v461_v2, %v1078_v24  ;;  %v546_v2 = vld [vmem:[%s1196_s0] sm:$0xff]  ;;  %s815_s0 = smov [#allocation3]  }
  0xc3   :  { %171 = vst [vmem:[#allocation2 + $0x58] sm:$0xc0] %v159_v3  ;;  %s734_s20 = sshll.u32 %s815_s0, 4  ;;  %s735_s20 = int_to_ptr.vmem [resolvable:$true] %s734_s20 }
  0xc4   :  { %177 = vst [vmem:[#allocation2 + $0x40] sm:$0x1] %v159_v3  ;;  %v514_v6 = vpop.permute.xlu0 %513 }
  0xc5   :  { %485 = vst [vmem:[#allocation2] sm:$0xe0] %v473_v4 }
  0xc6   :  { %486 = vst [vmem:[#allocation2 + $0x28] sm:$0xe0] %v474_v5 }
  0xc9   :  { %v1095_v26 = vpop.permute.xlu2 %218  ;;  %v518_v9 = vpop.permute.xlu1 %517 }
  0xcc   :  { %v516_v35 = vpop.permute.xlu0 %515  ;;  %v560_v18 = vld [vmem:[#allocation2] sm:$0xff] }
  0xcd   :  { %v528_v39 = vsel %vm527_vm7, %v514_v6, %v516_v35  ;;  %v529_v48 = vsel %vm527_vm7, %v516_v35, %v518_v9  ;;  %v561_v8 = vld [vmem:[#allocation2 + $0x28] sm:$0xff] }
  0xce   :  { %540 = vst [vmem:[#allocation2 + $0x80] sm:$0x7] %v528_v39 }
  0xcf   :  { %541 = vst [vmem:[#allocation2 + $0x90] sm:$0x7] %v529_v48 }
  0xd1   :  { %v1099_v11 = vpop.permute.xlu2 %86  ;;  %v1101_v14 = vpop.permute.xlu1 %521 }
  0xd2   :  { %v97_v13 = vsel %vm94_vm0, %v1013_v7, %v1099_v11  ;;  %v554_v7 = vld [vmem:[#allocation2 + $0x8] sm:$0xff] }
  0xd3   :  { %109 = vst [vmem:[#allocation2 + $0x58] sm:$0x38] %v97_v13 }
  0xd4   :  { %v520_v59 = vpop.permute.xlu0 %519 }
  0xd5   :  { %v530_v23 = vsel %vm527_vm7, %v518_v9, %v520_v59  ;;  %v531_v15 = vsel %vm527_vm7, %v520_v59, %v1101_v14  ;;  %v566_v16 = vld [vmem:[#allocation2 + $0x80] sm:$0xff] }
  0xd6   :  { %542 = vst [vmem:[#allocation2 + $0xa0] sm:$0x7] %v530_v23  ;;  %591 = vmatpush.msra.mxu0 %v566_v16  ;;  %760 = vmatpush.msra.mxu2 %v566_v16  ;;  %v567_v17 = vld [vmem:[#allocation2 + $0x90] sm:$0xff] }
  0xd7   :  { %543 = vst [vmem:[#allocation2 + $0x18] sm:$0x7] %v531_v15  ;;  %614 = vmatpush.msra.mxu1 %v567_v17  ;;  %764 = vmatpush.msra.mxu3 %v567_v17 }
  0xd8   :  { %592 = vmatpush.msra.mxu0 %v560_v18  ;;  %761 = vmatpush.msra.mxu2 %v560_v18 }
  0xd9   :  { %615 = vmatpush.msra.mxu1 %v561_v8  ;;  %765 = vmatpush.msra.mxu3 %v561_v8  ;;  %v526_v19 = vpop.permute.xlu2 %525  ;;  %v1109_v20 = vpop.permute.xlu1 %466 }
  0xda   :  { %593 = vmatpush.msra.mxu0 %v554_v7  ;;  %762 = vmatpush.msra.mxu2 %v554_v7  ;;  %v550_v56 = vld [vmem:[#allocation2 + $0x58] sm:$0xff] }
  0xdb   :  { %616 = vmatpush.msra.mxu1 %v555_v21  ;;  %766 = vmatpush.msra.mxu3 %v555_v21 }
  0xdc   :  { %v465_v25 = vpop.permute.xlu0 %464  ;;  %594 = vmatpush.msra.mxu0 %v548_v22  ;;  %763 = vmatpush.msra.mxu2 %v548_v22 }
  0xdd   :  { %v475_v28 = vsel %vm472_vm6, %v1078_v24, %v465_v25  ;;  %v476_v29 = vsel %vm472_vm6, %v465_v25, %v1109_v20  ;;  %617 = vmatpush.msra.mxu1 %v549_v27  ;;  %767 = vmatpush.msra.mxu3 %v549_v27  ;;  %v568_v30 = vld [vmem:[#allocation2 + $0xa0] sm:$0xff] }
  0xde   :  { %487 = vst [vmem:[#allocation2 + $0x50] sm:$0xe0] %v475_v28  ;;  %637 = vmatpush.msrb.mxu2 %v568_v30  ;;  %v569_v31 = vld [vmem:[#allocation2 + $0x18] sm:$0xff]  ;;  %751 = vmatmul.msk.f32.vlgmr.msra.gmra.mxu3 %vm572_vm8, %v1151_v55 }
  0xdf   :  { %488 = vst [vmem:[#allocation2 + $0x88] sm:$0xe0] %v476_v29  ;;  %660 = vmatpush.msrb.mxu3 %v569_v31  ;;  %749 = vmatmul.msk.f32.vlgmr.msra.gmra.mxu2 %vm572_vm8, %v1151_v55 }
  0xe0   :  { %748 = vmatmul.msk.f32.vlgmr.msra.gmra.mxu0 %vm572_vm8, %v546_v2  ;;  %750 = vmatmul.msk.f32.vlgmr.msra.gmra.mxu1 %vm572_vm8, %v546_v2 }
  0xe1   :  { %v1115_v33 = vpop.permute.xlu2 %406  ;;  %v217_v49 = vpop.permute.xlu1 %216 }
  0xe2   :  { %v415_v10 = vsel %vm410_vm5, %v1082_v58, %v1115_v33  ;;  %v227_v34 = vsel %vm224_vm2, %v1027_v12, %v217_v49  ;;  %v228_v37 = vsel %vm224_vm2, %v217_v49, %v1095_v26 }
  0xe3   :  { %427 = vst [vmem:[#allocation2 + $0xb0] sm:$0x1c] %v415_v10 }
  0xe4   :  { %239 = vst [vmem:[#allocation2 + $0x40] sm:$0xe] %v227_v34  ;;  %v1124_v36 = vpop.permute.xlu0 %150 }
  0xe5   :  { %240 = vst [vmem:[#allocation2 + $0x70] sm:$0xe] %v228_v37  ;;  %v160_v38 = vsel %vm156_vm1, %v1087_v1, %v1124_v36  ;;  %v562_v40 = vld [vmem:[#allocation2 + $0x50] sm:$0xff] }
  0xe6   :  { %172 = vst [vmem:[#allocation2 + $0x60] sm:$0xc0] %v160_v38  ;;  %638 = vmatpush.msrb.mxu2 %v562_v40  ;;  %v563_v41 = vld [vmem:[#allocation2 + $0x88] sm:$0xff] }
  0xe7   :  { %178 = vst [vmem:[#allocation2 + $0x70] sm:$0x1] %v160_v38  ;;  %661 = vmatpush.msrb.mxu3 %v563_v41 }
  0xe9   :  { %v471_v42 = vpop.permute.xlu2 %470  ;;  %v1129_v12 = vpop.permute.xlu1 %274 }
  0xec   :  { %v273_v43 = vpop.permute.xlu0 %272 }
  0xed   :  { %v283_v32 = vsel %vm280_vm4, %v1036_v50, %v273_v43  ;;  %v284_v44 = vsel %vm280_vm4, %v273_v43, %v1129_v12 }
  0xee   :  { %295 = vst [vmem:[#allocation2 + $0x40] sm:$0x70] %v283_v32 }
  0xef   :  { %296 = vst [vmem:[#allocation2 + $0x70] sm:$0x70] %v284_v44 }
  0xf1   :  { %v1135_v60 = vpop.permute.xlu2 %220  ;;  %v524_v45 = vpop.permute.xlu1 %523 }
  0xf2   :  { %v229_v46 = vsel %vm224_vm2, %v1095_v26, %v1135_v60  ;;  %v532_v47 = vsel %vm527_vm7, %v1101_v14, %v524_v45  ;;  %v533_v53 = vsel %vm527_vm7, %v524_v45, %v526_v19 }
  0xf3   :  { %241 = vst [vmem:[#allocation2 + $0x78] sm:$0xe] %v229_v46 }
  0xf4   :  { %544 = vst [vmem:[#allocation2 + $0x30] sm:$0x7] %v532_v47  ;;  %v1143_v50 = vpop.permute.xlu0 %88 }
  0xf5   :  { %545 = vst [vmem:[#allocation2 + $0xb8] sm:$0x7] %v533_v53  ;;  %v98_v52 = vsel %vm94_vm0, %v1099_v11, %v1143_v50  ;;  %v556_v24 = vld [vmem:[#allocation2 + $0x40] sm:$0xff] }
  0xf6   :  { %110 = vst [vmem:[#allocation2 + $0x60] sm:$0x38] %v98_v52  ;;  %639 = vmatpush.msrb.mxu2 %v556_v24  ;;  %v557_v54 = vld [vmem:[#allocation2 + $0x70] sm:$0xff] }
  0xf7   :  { %662 = vmatpush.msrb.mxu3 %v557_v54 }
  0xf8   :  { %640 = vmatpush.msrb.mxu2 %v550_v56 }
  0xf9   :  { %v341_v57 = vpop.permute.xlu1 %340  ;;  %752 = vmatmul.msk.f32.vlgmr.msrb.gmra.mxu2 %vm572_vm8, %v546_v2  ;;  %v279_v14 = vpop.permute.xlu2 %278 }
  0xfb   :  { %v570_v58 = vld [vmem:[#allocation2 + $0x30] sm:$0xff] }
  0xfc   :  { %v339_v61 = vpop.permute.xlu0 %338  ;;  %683 = vmatpush.msrb.mxu0 %v570_v58  ;;  %v571_v62 = vld [vmem:[#allocation2 + $0xb8] sm:$0xff] }
  0xfd   :  { %v347_v63 = vsel %vm342_vm3, %v1074_v51, %v339_v61  ;;  %v348_v0 = vsel %vm342_vm3, %v339_v61, %v341_v57  ;;  %v551_v1 = vld [vmem:[#allocation2 + $0x60] sm:$0xff]  ;;  %706 = vmatpush.msrb.mxu1 %v571_v62 }
  0xfe   :  { %359 = vst [vmem:[#allocation2 + $0x78] sm:$0x80] %v347_v63  ;;  %663 = vmatpush.msrb.mxu3 %v551_v1 }
  0xff   :  { %360 = vst [vmem:[#allocation2 + $0x38] sm:$0x80] %v348_v0  ;;  %754 = vmatmul.msk.f32.vlgmr.msrb.gmra.mxu3 %vm572_vm8, %v546_v2 }
 0x100   :  { %365 = vst [vmem:[#allocation2 + $0xb0] sm:$0x3] %v347_v63 }
 0x101   :  { %366 = vst [vmem:[#allocation2 + $0x98] sm:$0x3] %v348_v0  ;;  %v469_v3 = vpop.permute.xlu1 %468  ;;  %753 = vmatmul.msk.f32.gmra.mxu2 %vm572_vm8, %v1151_v55 }
 0x102   :  { %v477_v51 = vsel %vm472_vm6, %v1109_v20, %v469_v3  ;;  %v478_v4 = vsel %vm472_vm6, %v469_v3, %v471_v42 }
 0x103   :  { %489 = vst [vmem:[#allocation2 + $0xb0] sm:$0xe0] %v477_v51 }
 0x104   :  { %490 = vst [vmem:[#allocation2 + $0x98] sm:$0xe0] %v478_v4  ;;  %v409_v5 = vpop.permute.xlu0 %408 }
 0x105   :  { %v416_v6 = vsel %vm410_vm5, %v1115_v33, %v409_v5 }
 0x106   :  { %428 = vst [vmem:[#allocation2 + $0x98] sm:$0x1c] %v416_v6 }
 0x107   :  { %755 = vmatmul.msk.f32.gmra.mxu3 %vm572_vm8, %v1151_v55 }
 0x109   :  { %v155_v26 = vpop.permute.xlu1 %154 }
 0x10a   :  { %v564_v9 = vld [vmem:[#allocation2 + $0xb0] sm:$0xff] }
 0x10b   :  { %684 = vmatpush.msrb.mxu0 %v564_v9 }
 0x10c   :  { %v153_v35 = vpop.permute.xlu0 %152 }
 0x10d   :  { %v161_v39 = vsel %vm156_vm1, %v1124_v36, %v153_v35  ;;  %v162_v48 = vsel %vm156_vm1, %v153_v35, %v155_v26  ;;  %v565_v11 = vld [vmem:[#allocation2 + $0x98] sm:$0xff] }
 0x10e   :  { %173 = vst [vmem:[#allocation2 + $0xa8] sm:$0xc0] %v161_v39  ;;  %707 = vmatpush.msrb.mxu1 %v565_v11 }
 0x10f   :  { %174 = vst [vmem:[#allocation2 + $0x68] sm:$0xc0] %v162_v48 }
 0x110   :  { %179 = vst [vmem:[#allocation2 + $0x78] sm:$0x1] %v161_v39 }
 0x111   :  { %180 = vst [vmem:[#allocation2 + $0x38] sm:$0x1] %v162_v48  ;;  %v277_v13 = vpop.permute.xlu1 %276 }
 0x112   :  { %v285_v59 = vsel %vm280_vm4, %v1129_v12, %v277_v13  ;;  %v286_v23 = vsel %vm280_vm4, %v277_v13, %v279_v14 }
 0x113   :  { %297 = vst [vmem:[#allocation2 + $0x78] sm:$0x70] %v285_v59 }
 0x114   :  { %298 = vst [vmem:[#allocation2 + $0x38] sm:$0x70] %v286_v23  ;;  %v223_v15 = vpop.permute.xlu0 %222 }
 0x115   :  { %v230_v16 = vsel %vm224_vm2, %v1135_v60, %v223_v15 }
 0x116   :  { %242 = vst [vmem:[#allocation2 + $0x38] sm:$0xe] %v230_v16 }
 0x119   :  { %v93_v17 = vpop.permute.xlu1 %92 }
 0x11a   :  { %v558_v18 = vld [vmem:[#allocation2 + $0x78] sm:$0xff] }
 0x11b   :  { %685 = vmatpush.msrb.mxu0 %v558_v18 }
 0x11c   :  { %v91_v8 = vpop.permute.xlu0 %90 }
 0x11d   :  { %v99_v7 = vsel %vm94_vm0, %v1143_v50, %v91_v8  ;;  %v100_v19 = vsel %vm94_vm0, %v91_v8, %v93_v17  ;;  %v559_v20 = vld [vmem:[#allocation2 + $0x38] sm:$0xff] }
 0x11e   :  { %111 = vst [vmem:[#allocation2 + $0xa8] sm:$0x38] %v99_v7  ;;  %708 = vmatpush.msrb.mxu1 %v559_v20 }
 0x11f   :  { %112 = vst [vmem:[#allocation2 + $0x68] sm:$0x38] %v100_v19 }
 0x125   :  { %v552_v21 = vld [vmem:[#allocation2 + $0xa8] sm:$0xff] }
 0x126   :  { %686 = vmatpush.msrb.mxu0 %v552_v21  ;;  %v553_v22 = vld [vmem:[#allocation2 + $0x68] sm:$0xff] }
 0x127   :  { %709 = vmatpush.msrb.mxu1 %v553_v22  ;;  %756 = vmatmul.msk.f32.vlgmr.msrb.gmra.mxu0 %vm572_vm8, %v546_v2 }
 0x128   :  { %758 = vmatmul.msk.f32.vlgmr.msrb.gmra.mxu1 %vm572_vm8, %v546_v2 }
 0x12f   :  { %757 = vmatmul.msk.f32.gmra.mxu0 %vm572_vm8, %v1151_v55 }
 0x130   :  { %759 = vmatmul.msk.f32.gmra.mxu1 %vm572_vm8, %v1151_v55 }
 0x15d   :  { %v596_v28 = vpop.f32.mrf.mxu0  ;;  %v619_v29 = vpop.f32.mrf.mxu1 }
 0x15e   :  { %717 = vst [vmem:[#allocation3] sm:$0xff] %v596_v28 }
 0x15f   :  { %718 = vst [vmem:[#allocation3 + $0x8] sm:$0xff] %v619_v29 }
 0x161   :  { %v622_v27 = vpop.f32.mrf.mxu3 }
 0x162   :  { %v599_v25 = vpop.f32.mrf.mxu2  ;;  %721 = vst [vmem:[#allocation3 + $0x20] sm:$0xff] %v622_v27 }
 0x163   :  { %720 = vst [vmem:[#allocation3 + $0x18] sm:$0xff] %v599_v25 }
 0x17c   :  { %v642_v30 = vpop.f32.mrf.mxu2 }
 0x17d   :  { %719 = vst [vmem:[#allocation3 + $0x10] sm:$0xff] %v642_v30 }
 0x182   :  { %v665_v31 = vpop.f32.mrf.mxu3 }
 0x183   :  { %724 = vst [vmem:[#allocation3 + $0x30] sm:$0xff] %v665_v31 }
 0x184   :  { %v645_v33 = vpop.f32.mrf.mxu2 }
 0x185   :  { %722 = vst [vmem:[#allocation3 + $0x28] sm:$0xff] %v645_v33 }
 0x18a   :  { %v668_v49 = vpop.f32.mrf.mxu3 }
 0x18b   :  { %727 = vst [vmem:[#allocation3 + $0x48] sm:$0xff] %v668_v49 }
 0x1a4   :  { %v688_v10 = vpop.f32.mrf.mxu0 }
 0x1a5   :  { %725 = vst [vmem:[#allocation3 + $0x38] sm:$0xff] %v688_v10  ;;  %v711_v34 = vpop.f32.mrf.mxu1 }
 0x1a6   :  { %726 = vst [vmem:[#allocation3 + $0x40] sm:$0xff] %v711_v34 }
 0x1ac   :  { %v691_v37 = vpop.f32.mrf.mxu0 }
 0x1ad   :  { %728 = vst [vmem:[#allocation3 + $0x50] sm:$0xff] %v691_v37  ;;  %v714_v36 = vpop.f32.mrf.mxu1 }
 0x1ae   :  { %729 = vst [vmem:[#allocation3 + $0x58] sm:$0xff] %v714_v36 }
 0x1af   :  { %742 = dma.vmem_to_hbm [thread:$0]  %s735_s20, 1536, %s737_s11, [#allocation4], %s816_s12, %s816_s12, %s817_s14  }
 0x1b0   :  { %804 = dma.done.wait [#allocation4], 1536  }
 0x1b1   :  { %805 = vsyncadd [#allocation4], 4294965760 }
 0x1b2   :  { %747 = vsyncpa [#allocation4], 1 }

</bundles_post_ra>
